<compile_context>
chip_gen: v7x
topology: tpu7x:2x2x1
jax: 0.10.0
libtpu: 0.0.40
codegen_flags: <defaults>
</compile_context>

<pallas_src>
import jax
import jax.numpy as jnp
from jax.experimental import pallas as pl
from jax.experimental.pallas import tpu as pltpu

_LANES = 128
_SUBLANES = 8
_MAX_BLOCK_ROWS = 4096  # 4096 * 128 * 4 B = 2 MiB per buffer -> safe on v5e/v6e/v7x


def sincos_sq_kernel(x_ref, o_ref):
    """o = sin(x)^2 + cos(x)^2, elementwise on a lane-dense (rows, 128) tile."""
    x = x_ref[...]
    s = jnp.sin(x)
    c = jnp.cos(x)
    o_ref[...] = s * s + c * c


def model_forward(x):
    """Matches Model.forward: torch.sin(x)**2 + torch.cos(x)**2."""
    orig_shape = x.shape
    orig_dtype = x.dtype
    n = x.size

    # Flatten to a lane-dense 2D layout: last dim = 128 lanes, rows multiple of 8.
    tile_elems = _LANES * _SUBLANES
    pad = (-n) % tile_elems
    flat = x.reshape(-1)
    if pad:
        flat = jnp.pad(flat, (0, pad))
    rows = flat.shape[0] // _LANES
    x2 = flat.reshape(rows, _LANES)

    # Whole array in one block when small; otherwise tile rows (8-divisible).
    block_rows = rows if rows <= _MAX_BLOCK_ROWS else _MAX_BLOCK_ROWS
    grid = (pl.cdiv(rows, block_rows),)

    out2 = pl.pallas_call(
        sincos_sq_kernel,
        out_shape=jax.ShapeDtypeStruct((rows, _LANES), x2.dtype),
        grid=grid,
        in_specs=[pl.BlockSpec((block_rows, _LANES), lambda i: (i, 0))],
        out_specs=pl.BlockSpec((block_rows, _LANES), lambda i: (i, 0)),
        compiler_params=pltpu.CompilerParams(
            dimension_semantics=("parallel",)),
    )(x2)

    out = out2.reshape(-1)
    if pad:
        out = out[:n]
    return out.reshape(orig_shape).astype(orig_dtype)


def reference_forward(x):
    """Pure-JAX reference matching the PyTorch forward."""
    return jnp.sin(x) ** 2 + jnp.cos(x) ** 2


if __name__ == "__main__":
    B, C, H, W = 2, 4, 16, 16
    key = jax.random.PRNGKey(0)
    x = jax.random.normal(key, (B, C, H, W), jnp.float32)

    out = jax.block_until_ready(jax.jit(model_forward)(x))
    ref = reference_forward(x)

    assert out.shape == (B, C, H, W), out.shape
    if not bool(jnp.allclose(out, ref, rtol=1e-5, atol=1e-5)):
        raise AssertionError("Pallas output does not match JAX reference")
    print("KERNEL_OK")
</pallas_src>

<mosaic_0001>
module attributes {stable_mosaic.version = 11 : i64} {
  func.func @sincos_sq_kernel(%arg0: i32, %arg1: memref<16x128xf32, #tpu.memory_space<vmem>>, %arg2: memref<16x128xf32, #tpu.memory_space<vmem>>) attributes {dimension_semantics = [#tpu.dimension_semantics<parallel>], iteration_bounds = array<i64: 1>, scalar_prefetch = 0 : i64, scratch_operands = 0 : i64, tpu.core_type = #tpu.core_type<tc>, window_params = [{transform_indices = @transform_0, window_bounds = array<i64: 16, 128>}, {transform_indices = @transform_1, window_bounds = array<i64: 16, 128>}]} {
    %c0 = arith.constant 0 : index
    %c0_0 = arith.constant 0 : index
    %0 = vector.load %arg1[%c0, %c0_0] : memref<16x128xf32, #tpu.memory_space<vmem>>, vector<16x128xf32>
    %1 = math.sin %0 : vector<16x128xf32>
    %2 = math.cos %0 : vector<16x128xf32>
    %3 = arith.mulf %1, %1 : vector<16x128xf32>
    %4 = arith.mulf %2, %2 : vector<16x128xf32>
    %5 = arith.addf %3, %4 : vector<16x128xf32>
    %c0_1 = arith.constant 0 : index
    %c0_2 = arith.constant 0 : index
    %6 = vector.load %arg2[%c0_1, %c0_2] : memref<16x128xf32, #tpu.memory_space<vmem>>, vector<16x128xf32>
    tpu.vector_store %arg2[%c0_1, %c0_2], %5 {strides = array<i32>} : memref<16x128xf32, #tpu.memory_space<vmem>>, vector<16x128xf32>,
    return
  }
  func.func @transform_0(%arg0: i32) -> (i32, i32) {
    %c0_i32 = arith.constant 0 : i32
    %c0_i32_0 = arith.constant 0 : i32
    return %arg0, %c0_i32 : i32, i32
  }
  func.func @transform_1(%arg0: i32) -> (i32, i32) {
    %c0_i32 = arith.constant 0 : i32
    %c0_i32_0 = arith.constant 0 : i32
    return %arg0, %c0_i32 : i32, i32
  }
}

</mosaic_0001>

<bundles_post_ra>
// kernel: model_forward.1
= control target key start
LH: loop header
LB: loop body
LE: loop exit
PB: predicated region body
PF: predicated region fallthrough
CT: control target
= control target key end

     0   :  { %v474_v24 = vmov 683565275   ;;  %v475_v26 = vmov 2475754826   ;;  %v476_v28 = vmov 2131351028   ;;  %s572_s0 = inlined_call_operand.vmem [shape: f32[16,128], index: 0, kind: input, shape index: {}]   ;;  %s573_s1 = inlined_call_operand.vmem [shape: f32[16,128], index: 1, kind: output, shape index: {}]  }
   0x1   :  { %v493_v0 = vld [vmem:[%s572_s0] sm:$0xff]  ;;  %v498_v1 = vld [vmem:[%s572_s0 + $0x8] sm:$0xff]  ;;  %v477_v30 = vmov 2102212464   ;;  %v478_v32 = vmov 920167782  }
   0x2   :  { %v10_v2 = vand.u32 2147483647, %v493_v0  ;;  %v13_v3 = vand.u32 2139095040, %v493_v0  ;;  %v114_v4 = vand.u32 2147483647, %v498_v1  ;;  %v117_v5 = vand.u32 2139095040, %v498_v1 }
   0x3   :  { %v479_v40 = vmov 1326507024   ;;  %vm12_vm14 = vcmp.lt.s32.totalorder %v493_v0, 0 }
   0x4   :  { %v14_v6 = vshrl.u32 %v13_v3, 23  ;;  %v17_v7 = vand.u32 8388607, %v10_v2  ;;  %v118_v8 = vshrl.u32 %v117_v5, 23  ;;  %v121_v9 = vand.u32 8388607, %v114_v4 }
   0x5   :  { %vm11_vm15 = vcmp.le.f32.partialorder %v10_v2, 0.7853982 }
   0x6   :  { %v436_v10 = vadd.s32 4294967169, %v14_v6  ;;  %v440_v11 = vadd.s32 4294967169, %v118_v8  ;;  %v18_v13 = vor.u32 8388608, %v17_v7  ;;  %v122_v14 = vor.u32 8388608, %v121_v9 }
   0x8   :  { %v20_v12 = vadd.s32 1, %v436_v10  ;;  %v124_v15 = vadd.s32 1, %v440_v11  ;;  %v508_v20 = vshll.u32 %v18_v13, 8  ;;  %v510_v22 = vshll.u32 %v122_v14, 8 }
   0xa   :  { %vm21_vm0 = vcmp.gt.s32.totalorder %v20_v12, 0  ;;  %vm125_vm1 = vcmp.gt.s32.totalorder %v124_v15, 0 }
   0xb   :  { %v22_v16 = vsel %vm21_vm0, %v20_v12, 0  ;;  %v126_v19 = vsel %vm125_vm1, %v124_v15, 0  ;;  %vm116_vm0 = vcmp.lt.s32.totalorder %v498_v1, 0  ;;  %vm115_vm1 = vcmp.le.f32.partialorder %v114_v4, 0.7853982 }
   0xc   :  { %v23_v17 = vshrl.u32 %v22_v16, 5  ;;  %v24_v18 = vand.u32 31, %v22_v16  ;;  %v128_v21 = vand.u32 31, %v126_v19  ;;  %v512_v34 = vshrl.u32 %v126_v19, 5 }
   0xe   :  { %v25_v23 = vsub.s32 32, %v24_v18  ;;  %v27_v25 = vshll.u32 %v474_v24, %v24_v18  ;;  %v30_v27 = vshll.u32 %v475_v26, %v24_v18  ;;  %v33_v29 = vshll.u32 %v476_v28, %v24_v18 }
   0xf   :  { %v36_v31 = vshll.u32 %v477_v30, %v24_v18  ;;  %v39_v33 = vshll.u32 %v478_v32, %v24_v18  ;;  %vm42_vm2 = vcmp.lt.s32.totalorder %v23_v17, 1  ;;  %vm43_vm3 = vcmp.lt.s32.totalorder %v23_v17, 2 }
  0x10   :  { %v26_v35 = vshrl.u32 %v474_v24, %v25_v23  ;;  %v28_v36 = vshrl.u32 %v475_v26, %v25_v23  ;;  %v31_v37 = vshrl.u32 %v476_v28, %v25_v23  ;;  %v34_v38 = vshrl.u32 %v477_v30, %v25_v23 }
  0x11   :  { %v37_v39 = vshrl.u32 %v478_v32, %v25_v23  ;;  %v40_v41 = vshrl.u32 %v479_v40, %v25_v23  ;;  %vm45_vm4 = vcmp.lt.s32.totalorder %v23_v17, 4  ;;  %v129_v45 = vsub.s32 32, %v128_v21 }
  0x12   :  { %v29_v42 = vor.u32 %v28_v36, %v27_v25  ;;  %v32_v43 = vor.u32 %v31_v37, %v30_v27  ;;  %v35_v44 = vor.u32 %v34_v38, %v33_v29  ;;  %vm44_vm5 = vcmp.lt.s32.totalorder %v23_v17, 3 }
  0x13   :  { %v38_v46 = vor.u32 %v37_v39, %v36_v31  ;;  %v41_v47 = vor.u32 %v40_v41, %v39_v33  ;;  %v131_v48 = vshll.u32 %v474_v24, %v128_v21  ;;  %v134_v56 = vshll.u32 %v475_v26, %v128_v21 }
  0x14   :  { %v46_v49 = vsel %vm42_vm2, %v26_v35, %v29_v42  ;;  %v47_v50 = vsel %vm45_vm4, %v35_v44, 2102212464  ;;  %v50_v51 = vsel %vm42_vm2, %v29_v42, %v32_v43  ;;  %v54_v52 = vsel %vm42_vm2, %v32_v43, %v35_v44 }
  0x15   :  { %v48_v53 = vsel %vm44_vm5, %v32_v43, %v47_v50  ;;  %v51_v54 = vsel %vm45_vm4, %v38_v46, 920167782  ;;  %v55_v55 = vsel %vm45_vm4, %v41_v47, 1326507024  ;;  %v130_v59 = vshrl.u32 %v474_v24, %v129_v45 }
  0x16   :  { %v52_v57 = vsel %vm44_vm5, %v35_v44, %v51_v54  ;;  %v56_v58 = vsel %vm44_vm5, %v38_v46, %v55_v55  ;;  %v132_v60 = vshrl.u32 %v475_v26, %v129_v45  ;;  %v49_v61 = vsel %vm43_vm3, %v46_v49, %v48_v53 }
  0x17   :  { %v53_v62 = vsel %vm43_vm3, %v50_v51, %v52_v57  ;;  %v57_v63 = vsel %vm43_vm3, %v54_v52, %v56_v58  ;;  %v135_v3 = vshrl.u32 %v476_v28, %v129_v45  ;;  %v137_v11 = vshll.u32 %v476_v28, %v128_v21 }
  0x18   :  { %v521_v5 = vmul.u32.u64.low %v508_v20, %v57_v63  ;;  %v522_v6 = vmul.u32.u64.high %v508_v20, %v57_v63, %v521_v5  ;;  %v525_v7 = vmul.u32.u64.low %v508_v20, %v53_v62  ;;  %v526_v8 = vmul.u32.u64.high %v508_v20, %v53_v62, %v525_v7 }
  0x19   :  { %v133_v9 = vor.u32 %v132_v60, %v131_v48  ;;  %v136_v10 = vor.u32 %v135_v3, %v134_v56  ;;  %v138_v12 = vshrl.u32 %v477_v30, %v129_v45  ;;  %v140_v13 = vshll.u32 %v477_v30, %v128_v21 }
  0x1a   :  { %v141_v14 = vshrl.u32 %v478_v32, %v129_v45  ;;  %v143_v15 = vshll.u32 %v478_v32, %v128_v21  ;;  %v144_v16 = vshrl.u32 %v479_v40, %v129_v45  ;;  %v65_v17 = vmul.u32 %v508_v20, %v49_v61 }
  0x1b   :  { %v139_v18 = vor.u32 %v138_v12, %v137_v11  ;;  %vm146_vm6 = vcmp.lt.s32.totalorder %v512_v34, 1  ;;  %vm147_vm7 = vcmp.lt.s32.totalorder %v512_v34, 2  ;;  %vm67_vm8 = vc.u32 %v522_v6, %v525_v7 }
  0x1c   :  { %v68_v19 = vadd.s32 1, %v526_v8  ;;  %v142_v23 = vor.u32 %v141_v14, %v140_v13  ;;  %vm148_vm9 = vcmp.lt.s32.totalorder %v512_v34, 3  ;;  %v145_v24 = vor.u32 %v144_v16, %v143_v15 }
  0x1d   :  { %vm149_vm10 = vcmp.lt.s32.totalorder %v512_v34, 4  ;;  %v150_v25 = vsel %vm146_vm6, %v130_v59, %v133_v9  ;;  %v154_v21 = vsel %vm146_vm6, %v133_v9, %v136_v10  ;;  %v158_v28 = vsel %vm146_vm6, %v136_v10, %v139_v18 }
  0x1e   :  { %v69_v26 = vsel %vm67_vm8, %v68_v19, %v526_v8  ;;  %v151_v20 = vsel %vm149_vm10, %v139_v18, 2102212464  ;;  %v155_v27 = vsel %vm149_vm10, %v142_v23, 920167782  ;;  %v159_v32 = vsel %vm149_vm10, %v145_v24, 1326507024 }
  0x1f   :  { %v70_v29 = vadd.s32 %v69_v26, %v65_v17  ;;  %v152_v30 = vsel %vm148_vm9, %v136_v10, %v151_v20  ;;  %v156_v31 = vsel %vm148_vm9, %v139_v18, %v155_v27  ;;  %v160_v36 = vsel %vm148_vm9, %v142_v23, %v159_v32 }
  0x20   :  { %v153_v33 = vsel %vm147_vm7, %v150_v25, %v152_v30  ;;  %v157_v35 = vsel %vm147_vm7, %v154_v21, %v156_v31  ;;  %v161_v38 = vsel %vm147_vm7, %v158_v28, %v160_v36  ;;  %v66_v57 = vadd.s32 %v525_v7, %v522_v6 }
  0x21   :  { %v71_v37 = vadd.s32 536870912, %v70_v29  ;;  %v543_v39 = vmul.u32.u64.low %v510_v22, %v157_v35  ;;  %v544_v40 = vmul.u32.u64.high %v510_v22, %v157_v35, %v543_v39  ;;  %v169_v44 = vmul.u32 %v510_v22, %v153_v33 }
  0x22   :  { %v547_v41 = vmul.u32.u64.low %v510_v22, %v161_v38  ;;  %v548_v42 = vmul.u32.u64.high %v510_v22, %v161_v38, %v547_v41  ;;  %vm102_vm8 = vweird.f32 %v493_v0 }
  0x23   :  { %v72_v43 = vshrl.u32 %v71_v37, 30  ;;  %v172_v46 = vadd.s32 1, %v544_v40 }
  0x24   :  { %vm171_vm11 = vc.u32 %v548_v42, %v543_v39  ;;  %v170_v13 = vadd.s32 %v543_v39, %v548_v42 }
  0x25   :  { %v73_v45 = vshll.u32 %v72_v43, 30  ;;  %v173_v34 = vsel %vm171_vm11, %v172_v46, %v544_v40  ;;  %v96_v6 = vsub.s32 4, %v72_v43 }
  0x26   :  { %v174_v48 = vadd.s32 %v173_v34, %v169_v44 }
  0x27   :  { %v74_v47 = vsub.s32 %v70_v29, %v73_v45  ;;  %v97_v25 = vsel %vm12_vm14, %v96_v6, %v72_v43 }
  0x28   :  { %v175_v50 = vadd.s32 536870912, %v174_v48  ;;  %v99_v28 = vsel %vm11_vm15, 0, %v97_v25 }
  0x29   :  { %v76_v49 = vsub.s32 0, %v74_v47  ;;  %v103_v33 = vadd.s32 3, %v99_v28  ;;  %v311_v38 = vand.u32 3, %v99_v28 }
  0x2a   :  { %v176_v52 = vshrl.u32 %v175_v50, 30 }
  0x2b   :  { %v437_v51 = vmin.u32 %v76_v49, %v74_v47  ;;  %v104_v37 = vand.u32 3, %v103_v33  ;;  %vm316_vm3 = vcmp.eq.s32.totalorder %v311_v38, 2  ;;  %vm313_vm5 = vcmp.eq.s32.totalorder %v311_v38, 0 }
  0x2c   :  { %v177_v54 = vshll.u32 %v176_v52, 30  ;;  %v200_v32 = vsub.s32 4, %v176_v52  ;;  %vm312_vm7 = vcmp.lt.s32.totalorder %v311_v38, 2 }
  0x2d   :  { %v78_v53 = vclz %v437_v51  ;;  %vm109_vm2 = vcmp.eq.s32.totalorder %v104_v37, 2  ;;  %vm106_vm4 = vcmp.eq.s32.totalorder %v104_v37, 0  ;;  %vm105_vm6 = vcmp.lt.s32.totalorder %v104_v37, 2 }
  0x2e   :  { %v178_v56 = vsub.s32 %v174_v48, %v177_v54  ;;  %v201_v36 = vsel %vm116_vm0, %v200_v32, %v176_v52 }
  0x2f   :  { %v438_v55 = vadd.s32 4294967294, %v78_v53  ;;  %v203_v41 = vsel %vm115_vm1, 0, %v201_v36 }
  0x30   :  { %v180_v58 = vsub.s32 0, %v178_v56  ;;  %v207_v45 = vadd.s32 3, %v203_v41  ;;  %v414_v52 = vand.u32 3, %v203_v41 }
  0x31   :  { %vm439_vm12 = vcmp.lt.s32.totalorder %v438_v55, 0 }
  0x32   :  { %v81_v22 = vsel %vm439_vm12, 0, %v438_v55  ;;  %v441_v62 = vmin.u32 %v180_v58, %v178_v56  ;;  %v208_v50 = vand.u32 3, %v207_v45  ;;  %vm419_vm10 = vcmp.eq.s32.totalorder %v414_v52, 2 }
  0x33   :  { %v82_v59 = vsub.s32 32, %v81_v22  ;;  %v83_v60 = vshll.u32 %v74_v47, %v81_v22  ;;  %v86_v61 = vsub.s32 4294967266, %v81_v22  ;;  %vm416_vm12 = vcmp.eq.s32.totalorder %v414_v52, 0 }
  0x34   :  { %v182_v5 = vclz %v441_v62  ;;  %vm213_vm9 = vcmp.eq.s32.totalorder %v208_v50, 2  ;;  %vm210_vm11 = vcmp.eq.s32.totalorder %v208_v50, 0 }
  0x35   :  { %v84_v63 = vshrl.u32 %v66_v57, %v82_v59  ;;  %v87_v3 = vadd.s32 127, %v86_v61 }
  0x36   :  { %v442_v10 = vadd.s32 4294967294, %v182_v5 }
  0x37   :  { %v85_v8 = vor.u32 %v84_v63, %v83_v60  ;;  %v88_v9 = vshll.u32 %v87_v3, 23 }
  0x38   :  { %vm443_vm13 = vcmp.lt.s32.totalorder %v442_v10, 0 }
  0x39   :  { %v89_v11 = vor.u32 4788187, %v88_v9  ;;  %v92_v12 = vcvt.s32.f32 %v85_v8  ;;  %v185_v7 = vsel %vm443_vm13, 0, %v442_v10  ;;  %vm209_vm13 = vcmp.lt.s32.totalorder %v208_v50, 2 }
  0x3a   :  { %v186_v15 = vsub.s32 32, %v185_v7  ;;  %v187_v16 = vshll.u32 %v178_v56, %v185_v7  ;;  %v190_v17 = vsub.s32 4294967266, %v185_v7 }
  0x3b   :  { %v90_v14 = vand.u32 2147483647, %v89_v11 }
  0x3c   :  { %v188_v19 = vshrl.u32 %v170_v13, %v186_v15  ;;  %v191_v23 = vadd.s32 127, %v190_v17 }
  0x3d   :  { %v93_v18 = vmul.f32 %v92_v12, %v90_v14 }
  0x3e   :  { %v189_v21 = vor.u32 %v188_v19, %v187_v16  ;;  %v192_v26 = vshll.u32 %v191_v23, 23 }
  0x3f   :  { %v94_v24 = vxor.u32 2147483648, %v93_v18 }
  0x40   :  { %v193_v29 = vor.u32 4788187, %v192_v26  ;;  %v196_v30 = vcvt.s32.f32 %v189_v21 }
  0x41   :  { %v95_v20 = vsel %vm12_vm14, %v94_v24, %v93_v18  ;;  %vm415_vm14 = vcmp.lt.s32.totalorder %v414_v52, 2 }
  0x42   :  { %v98_v27 = vsel %vm11_vm15, %v493_v0, %v95_v20  ;;  %v194_v31 = vand.u32 2147483647, %v193_v29  ;;  %vm206_vm15 = vweird.f32 %v498_v1 }
  0x43   :  { %466 = vcosq.f32 %v98_v27 }
  0x44   :  { %468 = vsinq.f32 %v98_v27  ;;  %v197_v35 = vmul.f32 %v196_v30, %v194_v31 }
  0x46   :  { %v198_v2 = vxor.u32 2147483648, %v197_v35 }
  0x48   :  { %v199_v39 = vsel %vm116_vm0, %v198_v2, %v197_v35 }
  0x49   :  { %v202_v40 = vsel %vm115_vm1, %v498_v1, %v199_v39 }
  0x4a   :  { %470 = vcosq.f32 %v202_v40 }
  0x4b   :  { %472 = vsinq.f32 %v202_v40 }
  0x4d   :  { %v467_v42 = vpop.eup %466 }
  0x4e   :  { %v469_v43 = vpop.eup %468  ;;  %v110_v44 = vxor.u32 2147483648, %v467_v42 }
  0x4f   :  { %v107_v4 = vxor.u32 2147483648, %v469_v43 }
  0x50   :  { %v111_v46 = vsel %vm109_vm2, %v110_v44, %v469_v43  ;;  %v318_v47 = vsel %vm316_vm3, %v110_v44, %v469_v43 }
  0x51   :  { %v108_v34 = vsel %vm106_vm4, %v467_v42, %v107_v4  ;;  %v315_v48 = vsel %vm313_vm5, %v467_v42, %v107_v4 }
  0x52   :  { %v112_v49 = vsel %vm105_vm6, %v108_v34, %v111_v46  ;;  %v319_v51 = vsel %vm312_vm7, %v315_v48, %v318_v47 }
  0x53   :  { %v113_v53 = vsel %vm102_vm8, nan, %v112_v49  ;;  %v320_v54 = vsel %vm102_vm8, nan, %v319_v51 }
  0x54   :  { %v424_v55 = vmul.f32 %v113_v53, %v113_v53  ;;  %v426_v56 = vmul.f32 %v320_v54, %v320_v54  ;;  %v471_v57 = vpop.eup %470 }
  0x55   :  { %v473_v58 = vpop.eup %472  ;;  %v214_v59 = vxor.u32 2147483648, %v471_v57 }
  0x56   :  { %v428_v22 = vadd.f32 %v426_v56, %v424_v55  ;;  %v211_v0 = vxor.u32 2147483648, %v473_v58 }
  0x57   :  { %v215_v60 = vsel %vm213_vm9, %v214_v59, %v473_v58  ;;  %v421_v61 = vsel %vm419_vm10, %v214_v59, %v473_v58 }
  0x58   :  { %430 = vst [vmem:[%s573_s1] sm:$0xff] %v428_v22  ;;  %v212_v62 = vsel %vm210_vm11, %v471_v57, %v211_v0  ;;  %v418_v63 = vsel %vm416_vm12, %v471_v57, %v211_v0 }
  0x59   :  { %v216_v3 = vsel %vm209_vm13, %v212_v62, %v215_v60  ;;  %v422_v5 = vsel %vm415_vm14, %v418_v63, %v421_v61 }
  0x5a   :  { %v217_v8 = vsel %vm206_vm15, nan, %v216_v3  ;;  %v423_v9 = vsel %vm206_vm15, nan, %v422_v5 }
  0x5b   :  { %v425_v10 = vmul.f32 %v217_v8, %v217_v8  ;;  %v427_v11 = vmul.f32 %v423_v9, %v423_v9 }
  0x5d   :  { %v429_v12 = vadd.f32 %v427_v11, %v425_v10 }
  0x5f   :  { %431 = vst [vmem:[%s573_s1 + $0x8] sm:$0xff] %v429_v12 }

</bundles_post_ra>
